<compile_context>
chip_gen: v5e
topology: v5e:2x2
jax: 0.10.0
libtpu: 0.0.40
codegen_flags: <defaults>
</compile_context>

<pallas_src>
import functools
import math

import jax
import jax.numpy as jnp
from jax.experimental import pallas as pl
from jax.experimental.pallas import tpu as pltpu


def self_attention_kernel(x_ref, wqkv_ref, wu_ref, bu_ref, o_ref, oh_ref,
                          *, heads, mxu_dtype):
    """One batch row per grid step: fused QKV projection + per-head softmax attn + unify."""
    hk = oh_ref.shape[1]              # heads * dk
    dk = hk // heads

    # Single cast of the input, single 768-wide projection matmul (scale folded into Wq).
    x = x_ref[0].astype(mxu_dtype)                                    # (t, k)
    qkv = jnp.dot(x, wqkv_ref[...], preferred_element_type=jnp.float32)  # (t, 3*hk) f32

    # `heads` is small and static -> unrolled Python loop (full LLO scheduling visibility).
    for hh in range(heads):
        lo = hh * dk
        q = qkv[:, lo:lo + dk]                      # (t, dk) f32 (already scaled)
        kk = qkv[:, hk + lo:hk + lo + dk]           # (t, dk)
        v = qkv[:, 2 * hk + lo:2 * hk + lo + dk]    # (t, dk)

        # scores = (q / sqrt(dk)) @ k^T ; softmax over keys (dim=2 in the PyTorch module).
        s = jax.lax.dot_general(
            q.astype(mxu_dtype), kk.astype(mxu_dtype),
            (((1,), (1,)), ((), ())),
            preferred_element_type=jnp.float32)                       # (t, t) f32
        m = jnp.max(s, axis=-1, keepdims=True)
        e = jnp.exp(s - m)
        denom = jnp.sum(e, axis=-1, keepdims=True)
        p = e * pl.reciprocal(denom, approx=True)                     # EUP vrcp (approx)

        # TODO(synk): nn.Dropout(p=0.1) on the attention weights is eval-mode identity here;
        # training-mode stochastic dropout (pltpu.prng_*) is intentionally not implemented.

        o_h = jnp.dot(p.astype(mxu_dtype), v.astype(mxu_dtype),
                      preferred_element_type=jnp.float32)             # (t, dk) f32
        oh_ref[:, lo:lo + dk] = o_h          # static lane-offset store into (t, 256) scratch

    # unify_heads(concat_h o_h) == one (t, 256) @ (256, k_out) matmul, bias added once.
    out = jnp.dot(oh_ref[...].astype(mxu_dtype), wu_ref[...],
                  preferred_element_type=jnp.float32)                 # (t, k_out)
    o_ref[0] = (out + bu_ref[...]).astype(o_ref.dtype)


def self_attention_forward(x, params, *, mxu_dtype=jnp.bfloat16):
    """x: (b, t, k) f32. params: wq/wk/wv (heads,k,dk), wu (heads,dk,k_out), bu (1,k_out)."""
    b, t, k = x.shape
    wq, wk, wv, wu, bu = (params[n] for n in ("wq", "wk", "wv", "wu", "bu"))
    heads, _, dk = wq.shape
    k_out = wu.shape[2]
    hk = heads * dk
    scale = 1.0 / math.sqrt(dk)      # module divides scores by sqrt(per-head k)

    # Pre-pack (one-time, outside the kernel): per-head slabs -> 2-D lane-dense slabs.
    #   wqkv: (k, 3*heads*dk) with the 1/sqrt(dk) scale folded into the Wq columns.
    #   wu2 : (heads*dk, k_out) so unify is a single K=256 matmul.
    pack = lambda w: jnp.transpose(w, (1, 0, 2)).reshape(k, hk)
    wqkv = jnp.concatenate([pack(wq) * scale, pack(wk), pack(wv)], axis=1).astype(mxu_dtype)
    wu2 = wu.reshape(hk, k_out).astype(mxu_dtype)
    bu2 = bu.astype(jnp.float32)

    const2 = lambda i: (0, 0)        # weights: constant index_map -> VMEM-resident

    kernel = functools.partial(self_attention_kernel, heads=heads, mxu_dtype=mxu_dtype)
    return pl.pallas_call(
        kernel,
        out_shape=jax.ShapeDtypeStruct((b, t, k_out), jnp.float32),
        grid=(b,),
        in_specs=[
            pl.BlockSpec((1, t, k), lambda i: (i, 0, 0)),   # x: one batch row per step
            pl.BlockSpec((k, 3 * hk), const2),              # packed Wq|Wk|Wv (scale folded)
            pl.BlockSpec((hk, k_out), const2),              # packed unify weight
            pl.BlockSpec((1, k_out), const2),               # unify bias
        ],
        out_specs=pl.BlockSpec((1, t, k_out), lambda i: (i, 0, 0)),
        scratch_shapes=[pltpu.VMEM((t, hk), jnp.float32)],  # per-head outputs, lane-concat
        compiler_params=pltpu.CompilerParams(
            # Batch rows are independent -> shard the grid across TensorCores on v7x.
            dimension_semantics=("parallel",),
            # Tiny footprint at these shapes; re-derive per generation (64 MiB on v7x vs
            # 128 MiB on v5e/v6e) and drop weight buffering once tiles are scaled up.
            vmem_limit_bytes=32 * 1024 * 1024,
        ),
    )(x, wqkv, wu2, bu2)


def init_params(key, k, heads):
    """Deterministic nn.Linear-default (Kaiming-uniform-like) init in per-head layout."""
    kq, kk_, kv, ku, kb = jax.random.split(key, 5)

    def uni(rng, shape, fan_in):
        bound = 1.0 / math.sqrt(fan_in)
        return jax.random.uniform(rng, shape, jnp.float32, -bound, bound)

    return {
        # to_queries / to_keys / to_values: Linear(k, k*heads, bias=False),
        # stored pre-transposed per head as (heads, k, k) so q_h = x @ W[h].
        "wq": uni(kq, (heads, k, k), k),
        "wk": uni(kk_, (heads, k, k), k),
        "wv": uni(kv, (heads, k, k), k),
        # unify_heads: Linear(k*heads, k) with bias, stored as per-head (heads, k, k) slabs.
        "wu": uni(ku, (heads, k, k), k * heads),
        "bu": uni(kb, (1, k), k * heads),
    }


def reference_forward(x, params):
    """Plain-JAX f32 reference with identical math / weight layout (eval-mode dropout)."""
    wq, wk, wv, wu, bu = (params[n] for n in ("wq", "wk", "wv", "wu", "bu"))
    dk = wq.shape[2]
    q = jnp.einsum("btk,hkd->bhtd", x, wq)
    kk = jnp.einsum("btk,hkd->bhtd", x, wk)
    v = jnp.einsum("btk,hkd->bhtd", x, wv)
    s = jnp.einsum("bhtd,bhsd->bhts", q, kk) / math.sqrt(dk)
    p = jax.nn.softmax(s, axis=-1)
    o = jnp.einsum("bhts,bhsd->bhtd", p, v)
    return jnp.einsum("bhtd,hdk->btk", o, wu) + bu


if __name__ == "__main__":
    # x: (batch, seq, embed) = (2, 8, 32), 8 attention heads (per-head dim == k == 32).
    b, t, k, heads = 2, 8, 32, 8

    key = jax.random.PRNGKey(0)
    kx, kp = jax.random.split(key)
    x = jax.random.normal(kx, (b, t, k), jnp.float32)
    params = init_params(kp, k, heads)

    ref = reference_forward(x, params)

    # f32-operand path: only the approx EUP reciprocal (~2^-12 rel) separates it from ref.
    out_f32 = jax.block_until_ready(
        self_attention_forward(x, params, mxu_dtype=jnp.float32))
    assert out_f32.shape == (b, t, k)
    assert jnp.allclose(out_f32, ref, rtol=2e-3, atol=2e-3), \
        float(jnp.max(jnp.abs(out_f32 - ref)))

    # Default perf path: bf16 MXU operands, f32 accumulation, f32 softmax -> looser tolerance.
    out = jax.block_until_ready(self_attention_forward(x, params))
    assert out.shape == (b, t, k)
    assert jnp.allclose(out, ref, rtol=6e-2, atol=6e-2), \
        float(jnp.max(jnp.abs(out - ref)))

    print("KERNEL_OK")
</pallas_src>

<mosaic_0001>
module attributes {stable_mosaic.version = 11 : i64} {
  func.func @self_attention_kernel(%arg0: i32, %arg1: memref<1x8x32xf32, #tpu.memory_space<vmem>>, %arg2: memref<32x768xf32, #tpu.memory_space<vmem>>, %arg3: memref<256x32xf32, #tpu.memory_space<vmem>>, %arg4: memref<1x32xf32, #tpu.memory_space<vmem>>, %arg5: memref<1x8x32xf32, #tpu.memory_space<vmem>>, %arg6: memref<8x256xf32, #tpu.memory_space<vmem>>) attributes {dimension_semantics = [#tpu.dimension_semantics<parallel>], iteration_bounds = array<i64: 2>, scalar_prefetch = 0 : i64, scratch_operands = 1 : i64, tpu.core_type = #tpu.core_type<tc>, window_params = [{transform_indices = @transform_0, window_bounds = array<i64: 1, 8, 32>}, {pipeline_mode = #tpu.pipeline_mode<synchronous>, transform_indices = @transform_1, window_bounds = array<i64: 32, 768>}, {pipeline_mode = #tpu.pipeline_mode<synchronous>, transform_indices = @transform_2, window_bounds = array<i64: 256, 32>}, {pipeline_mode = #tpu.pipeline_mode<synchronous>, transform_indices = @transform_3, window_bounds = array<i64: 1, 32>}, {transform_indices = @transform_4, window_bounds = array<i64: 1, 8, 32>}]} {
    %c0 = arith.constant 0 : index
    %c0_0 = arith.constant 0 : index
    %c0_1 = arith.constant 0 : index
    %0 = vector.load %arg1[%c0, %c0_0, %c0_1] : memref<1x8x32xf32, #tpu.memory_space<vmem>>, vector<1x8x32xf32>
    %1 = vector.shape_cast %0 : vector<1x8x32xf32> to vector<8x32xf32>
    %c0_2 = arith.constant 0 : index
    %c0_3 = arith.constant 0 : index
    %2 = vector.load %arg2[%c0_2, %c0_3] : memref<32x768xf32, #tpu.memory_space<vmem>>, vector<32x768xf32>
    %cst = arith.constant dense<0.000000e+00> : vector<8x768xf32>
    %3 = tpu.matmul %1, %2, %cst {dimension_numbers = #tpu.dot_dimension_numbers<[1], [0], [0], [1], [0, 0, 1, 1], [], []>} : vector<8x32xf32>, vector<32x768xf32>, vector<8x768xf32> -> vector<8x768xf32>
    %4 = vector.extract_strided_slice %3 {offsets = [0, 0], sizes = [8, 32], strides = [1, 1]} : vector<8x768xf32> to vector<8x32xf32>
    %5 = vector.extract_strided_slice %3 {offsets = [0, 256], sizes = [8, 32], strides = [1, 1]} : vector<8x768xf32> to vector<8x32xf32>
    %6 = vector.extract_strided_slice %3 {offsets = [0, 512], sizes = [8, 32], strides = [1, 1]} : vector<8x768xf32> to vector<8x32xf32>
    %cst_4 = arith.constant dense<0.000000e+00> : vector<8x8xf32>
    %7 = tpu.matmul %4, %5, %cst_4 {dimension_numbers = #tpu.dot_dimension_numbers<[1], [1], [0], [0], [0, 0, 1, 0], [], []>} : vector<8x32xf32>, vector<8x32xf32>, vector<8x8xf32> -> vector<8x8xf32>
    %cst_5 = arith.constant dense<0xFF800000> : vector<8xf32>
    %8 = vector.multi_reduction <maximumf>, %7, %cst_5 [1] : vector<8x8xf32> to vector<8xf32>
    %9 = vector.shape_cast %8 : vector<8xf32> to vector<8x1xf32>
    %10 = vector.broadcast %9 : vector<8x1xf32> to vector<8x8xf32>
    %11 = arith.subf %7, %10 : vector<8x8xf32>
    %12 = math.exp %11 : vector<8x8xf32>
    %cst_6 = arith.constant dense<0.000000e+00> : vector<8xf32>
    %13 = vector.multi_reduction <add>, %12, %cst_6 [1] : vector<8x8xf32> to vector<8xf32>
    %14 = vector.shape_cast %13 : vector<8xf32> to vector<8x1xf32>
    %15 = tpu.reciprocal %14 {approx = true} : vector<8x1xf32> -> vector<8x1xf32>
    %16 = vector.broadcast %15 : vector<8x1xf32> to vector<8x8xf32>
    %17 = arith.mulf %12, %16 : vector<8x8xf32>
    %cst_7 = arith.constant dense<0.000000e+00> : vector<8x32xf32>
    %18 = tpu.matmul %17, %6, %cst_7 {dimension_numbers = #tpu.dot_dimension_numbers<[1], [0], [0], [1], [0, 0, 1, 1], [], []>} : vector<8x8xf32>, vector<8x32xf32>, vector<8x32xf32> -> vector<8x32xf32>
    %c0_8 = arith.constant 0 : index
    %c0_9 = arith.constant 0 : index
    %19 = vector.load %arg6[%c0_8, %c0_9] : memref<8x256xf32, #tpu.memory_space<vmem>>, vector<8x32xf32>
    tpu.vector_store %arg6[%c0_8, %c0_9], %18 {strides = array<i32>} : memref<8x256xf32, #tpu.memory_space<vmem>>, vector<8x32xf32>,
    %20 = vector.extract_strided_slice %3 {offsets = [0, 32], sizes = [8, 32], strides = [1, 1]} : vector<8x768xf32> to vector<8x32xf32>
    %21 = vector.extract_strided_slice %3 {offsets = [0, 288], sizes = [8, 32], strides = [1, 1]} : vector<8x768xf32> to vector<8x32xf32>
    %22 = vector.extract_strided_slice %3 {offsets = [0, 544], sizes = [8, 32], strides = [1, 1]} : vector<8x768xf32> to vector<8x32xf32>
    %cst_10 = arith.constant dense<0.000000e+00> : vector<8x8xf32>
    %23 = tpu.matmul %20, %21, %cst_10 {dimension_numbers = #tpu.dot_dimension_numbers<[1], [1], [0], [0], [0, 0, 1, 0], [], []>} : vector<8x32xf32>, vector<8x32xf32>, vector<8x8xf32> -> vector<8x8xf32>
    %cst_11 = arith.constant dense<0xFF800000> : vector<8xf32>
    %24 = vector.multi_reduction <maximumf>, %23, %cst_11 [1] : vector<8x8xf32> to vector<8xf32>
    %25 = vector.shape_cast %24 : vector<8xf32> to vector<8x1xf32>
    %26 = vector.broadcast %25 : vector<8x1xf32> to vector<8x8xf32>
    %27 = arith.subf %23, %26 : vector<8x8xf32>
    %28 = math.exp %27 : vector<8x8xf32>
    %cst_12 = arith.constant dense<0.000000e+00> : vector<8xf32>
    %29 = vector.multi_reduction <add>, %28, %cst_12 [1] : vector<8x8xf32> to vector<8xf32>
    %30 = vector.shape_cast %29 : vector<8xf32> to vector<8x1xf32>
    %31 = tpu.reciprocal %30 {approx = true} : vector<8x1xf32> -> vector<8x1xf32>
    %32 = vector.broadcast %31 : vector<8x1xf32> to vector<8x8xf32>
    %33 = arith.mulf %28, %32 : vector<8x8xf32>
    %cst_13 = arith.constant dense<0.000000e+00> : vector<8x32xf32>
    %34 = tpu.matmul %33, %22, %cst_13 {dimension_numbers = #tpu.dot_dimension_numbers<[1], [0], [0], [1], [0, 0, 1, 1], [], []>} : vector<8x8xf32>, vector<8x32xf32>, vector<8x32xf32> -> vector<8x32xf32>
    %c0_14 = arith.constant 0 : index
    %c32 = arith.constant 32 : index
    %35 = vector.load %arg6[%c0_14, %c32] : memref<8x256xf32, #tpu.memory_space<vmem>>, vector<8x32xf32>
    tpu.vector_store %arg6[%c0_14, %c32], %34 {strides = array<i32>} : memref<8x256xf32, #tpu.memory_space<vmem>>, vector<8x32xf32>,
    %36 = vector.extract_strided_slice %3 {offsets = [0, 64], sizes = [8, 32], strides = [1, 1]} : vector<8x768xf32> to vector<8x32xf32>
    %37 = vector.extract_strided_slice %3 {offsets = [0, 320], sizes = [8, 32], strides = [1, 1]} : vector<8x768xf32> to vector<8x32xf32>
    %38 = vector.extract_strided_slice %3 {offsets = [0, 576], sizes = [8, 32], strides = [1, 1]} : vector<8x768xf32> to vector<8x32xf32>
    %cst_15 = arith.constant dense<0.000000e+00> : vector<8x8xf32>
    %39 = tpu.matmul %36, %37, %cst_15 {dimension_numbers = #tpu.dot_dimension_numbers<[1], [1], [0], [0], [0, 0, 1, 0], [], []>} : vector<8x32xf32>, vector<8x32xf32>, vector<8x8xf32> -> vector<8x8xf32>
    %cst_16 = arith.constant dense<0xFF800000> : vector<8xf32>
    %40 = vector.multi_reduction <maximumf>, %39, %cst_16 [1] : vector<8x8xf32> to vector<8xf32>
    %41 = vector.shape_cast %40 : vector<8xf32> to vector<8x1xf32>
    %42 = vector.broadcast %41 : vector<8x1xf32> to vector<8x8xf32>
    %43 = arith.subf %39, %42 : vector<8x8xf32>
    %44 = math.exp %43 : vector<8x8xf32>
    %cst_17 = arith.constant dense<0.000000e+00> : vector<8xf32>
    %45 = vector.multi_reduction <add>, %44, %cst_17 [1] : vector<8x8xf32> to vector<8xf32>
    %46 = vector.shape_cast %45 : vector<8xf32> to vector<8x1xf32>
    %47 = tpu.reciprocal %46 {approx = true} : vector<8x1xf32> -> vector<8x1xf32>
    %48 = vector.broadcast %47 : vector<8x1xf32> to vector<8x8xf32>
    %49 = arith.mulf %44, %48 : vector<8x8xf32>
    %cst_18 = arith.constant dense<0.000000e+00> : vector<8x32xf32>
    %50 = tpu.matmul %49, %38, %cst_18 {dimension_numbers = #tpu.dot_dimension_numbers<[1], [0], [0], [1], [0, 0, 1, 1], [], []>} : vector<8x8xf32>, vector<8x32xf32>, vector<8x32xf32> -> vector<8x32xf32>
    %c0_19 = arith.constant 0 : index
    %c64 = arith.constant 64 : index
    %51 = vector.load %arg6[%c0_19, %c64] : memref<8x256xf32, #tpu.memory_space<vmem>>, vector<8x32xf32>
    tpu.vector_store %arg6[%c0_19, %c64], %50 {strides = array<i32>} : memref<8x256xf32, #tpu.memory_space<vmem>>, vector<8x32xf32>,
    %52 = vector.extract_strided_slice %3 {offsets = [0, 96], sizes = [8, 32], strides = [1, 1]} : vector<8x768xf32> to vector<8x32xf32>
    %53 = vector.extract_strided_slice %3 {offsets = [0, 352], sizes = [8, 32], strides = [1, 1]} : vector<8x768xf32> to vector<8x32xf32>
    %54 = vector.extract_strided_slice %3 {offsets = [0, 608], sizes = [8, 32], strides = [1, 1]} : vector<8x768xf32> to vector<8x32xf32>
    %cst_20 = arith.constant dense<0.000000e+00> : vector<8x8xf32>
    %55 = tpu.matmul %52, %53, %cst_20 {dimension_numbers = #tpu.dot_dimension_numbers<[1], [1], [0], [0], [0, 0, 1, 0], [], []>} : vector<8x32xf32>, vector<8x32xf32>, vector<8x8xf32> -> vector<8x8xf32>
    %cst_21 = arith.constant dense<0xFF800000> : vector<8xf32>
    %56 = vector.multi_reduction <maximumf>, %55, %cst_21 [1] : vector<8x8xf32> to vector<8xf32>
    %57 = vector.shape_cast %56 : vector<8xf32> to vector<8x1xf32>
    %58 = vector.broadcast %57 : vector<8x1xf32> to vector<8x8xf32>
    %59 = arith.subf %55, %58 : vector<8x8xf32>
    %60 = math.exp %59 : vector<8x8xf32>
    %cst_22 = arith.constant dense<0.000000e+00> : vector<8xf32>
    %61 = vector.multi_reduction <add>, %60, %cst_22 [1] : vector<8x8xf32> to vector<8xf32>
    %62 = vector.shape_cast %61 : vector<8xf32> to vector<8x1xf32>
    %63 = tpu.reciprocal %62 {approx = true} : vector<8x1xf32> -> vector<8x1xf32>
    %64 = vector.broadcast %63 : vector<8x1xf32> to vector<8x8xf32>
    %65 = arith.mulf %60, %64 : vector<8x8xf32>
    %cst_23 = arith.constant dense<0.000000e+00> : vector<8x32xf32>
    %66 = tpu.matmul %65, %54, %cst_23 {dimension_numbers = #tpu.dot_dimension_numbers<[1], [0], [0], [1], [0, 0, 1, 1], [], []>} : vector<8x8xf32>, vector<8x32xf32>, vector<8x32xf32> -> vector<8x32xf32>
    %c0_24 = arith.constant 0 : index
    %c96 = arith.constant 96 : index
    %67 = vector.load %arg6[%c0_24, %c96] : memref<8x256xf32, #tpu.memory_space<vmem>>, vector<8x32xf32>
    tpu.vector_store %arg6[%c0_24, %c96], %66 {strides = array<i32>} : memref<8x256xf32, #tpu.memory_space<vmem>>, vector<8x32xf32>,
    %68 = vector.extract_strided_slice %3 {offsets = [0, 128], sizes = [8, 32], strides = [1, 1]} : vector<8x768xf32> to vector<8x32xf32>
    %69 = vector.extract_strided_slice %3 {offsets = [0, 384], sizes = [8, 32], strides = [1, 1]} : vector<8x768xf32> to vector<8x32xf32>
    %70 = vector.extract_strided_slice %3 {offsets = [0, 640], sizes = [8, 32], strides = [1, 1]} : vector<8x768xf32> to vector<8x32xf32>
    %cst_25 = arith.constant dense<0.000000e+00> : vector<8x8xf32>
    %71 = tpu.matmul %68, %69, %cst_25 {dimension_numbers = #tpu.dot_dimension_numbers<[1], [1], [0], [0], [0, 0, 1, 0], [], []>} : vector<8x32xf32>, vector<8x32xf32>, vector<8x8xf32> -> vector<8x8xf32>
    %cst_26 = arith.constant dense<0xFF800000> : vector<8xf32>
    %72 = vector.multi_reduction <maximumf>, %71, %cst_26 [1] : vector<8x8xf32> to vector<8xf32>
    %73 = vector.shape_cast %72 : vector<8xf32> to vector<8x1xf32>
    %74 = vector.broadcast %73 : vector<8x1xf32> to vector<8x8xf32>
    %75 = arith.subf %71, %74 : vector<8x8xf32>
    %76 = math.exp %75 : vector<8x8xf32>
    %cst_27 = arith.constant dense<0.000000e+00> : vector<8xf32>
    %77 = vector.multi_reduction <add>, %76, %cst_27 [1] : vector<8x8xf32> to vector<8xf32>
    %78 = vector.shape_cast %77 : vector<8xf32> to vector<8x1xf32>
    %79 = tpu.reciprocal %78 {approx = true} : vector<8x1xf32> -> vector<8x1xf32>
    %80 = vector.broadcast %79 : vector<8x1xf32> to vector<8x8xf32>
    %81 = arith.mulf %76, %80 : vector<8x8xf32>
    %cst_28 = arith.constant dense<0.000000e+00> : vector<8x32xf32>
    %82 = tpu.matmul %81, %70, %cst_28 {dimension_numbers = #tpu.dot_dimension_numbers<[1], [0], [0], [1], [0, 0, 1, 1], [], []>} : vector<8x8xf32>, vector<8x32xf32>, vector<8x32xf32> -> vector<8x32xf32>
    %c0_29 = arith.constant 0 : index
    %c128 = arith.constant 128 : index
    %83 = vector.load %arg6[%c0_29, %c128] : memref<8x256xf32, #tpu.memory_space<vmem>>, vector<8x32xf32>
    tpu.vector_store %arg6[%c0_29, %c128], %82 {strides = array<i32>} : memref<8x256xf32, #tpu.memory_space<vmem>>, vector<8x32xf32>,
    %84 = vector.extract_strided_slice %3 {offsets = [0, 160], sizes = [8, 32], strides = [1, 1]} : vector<8x768xf32> to vector<8x32xf32>
    %85 = vector.extract_strided_slice %3 {offsets = [0, 416], sizes = [8, 32], strides = [1, 1]} : vector<8x768xf32> to vector<8x32xf32>
    %86 = vector.extract_strided_slice %3 {offsets = [0, 672], sizes = [8, 32], strides = [1, 1]} : vector<8x768xf32> to vector<8x32xf32>
    %cst_30 = arith.constant dense<0.000000e+00> : vector<8x8xf32>
    %87 = tpu.matmul %84, %85, %cst_30 {dimension_numbers = #tpu.dot_dimension_numbers<[1], [1], [0], [0], [0, 0, 1, 0], [], []>} : vector<8x32xf32>, vector<8x32xf32>, vector<8x8xf32> -> vector<8x8xf32>
    %cst_31 = arith.constant dense<0xFF800000> : vector<8xf32>
    %88 = vector.multi_reduction <maximumf>, %87, %cst_31 [1] : vector<8x8xf32> to vector<8xf32>
    %89 = vector.shape_cast %88 : vector<8xf32> to vector<8x1xf32>
    %90 = vector.broadcast %89 : vector<8x1xf32> to vector<8x8xf32>
    %91 = arith.subf %87, %90 : vector<8x8xf32>
    %92 = math.exp %91 : vector<8x8xf32>
    %cst_32 = arith.constant dense<0.000000e+00> : vector<8xf32>
    %93 = vector.multi_reduction <add>, %92, %cst_32 [1] : vector<8x8xf32> to vector<8xf32>
    %94 = vector.shape_cast %93 : vector<8xf32> to vector<8x1xf32>
    %95 = tpu.reciprocal %94 {approx = true} : vector<8x1xf32> -> vector<8x1xf32>
    %96 = vector.broadcast %95 : vector<8x1xf32> to vector<8x8xf32>
    %97 = arith.mulf %92, %96 : vector<8x8xf32>
    %cst_33 = arith.constant dense<0.000000e+00> : vector<8x32xf32>
    %98 = tpu.matmul %97, %86, %cst_33 {dimension_numbers = #tpu.dot_dimension_numbers<[1], [0], [0], [1], [0, 0, 1, 1], [], []>} : vector<8x8xf32>, vector<8x32xf32>, vector<8x32xf32> -> vector<8x32xf32>
    %c0_34 = arith.constant 0 : index
    %c160 = arith.constant 160 : index
    %99 = vector.load %arg6[%c0_34, %c160] : memref<8x256xf32, #tpu.memory_space<vmem>>, vector<8x32xf32>
    tpu.vector_store %arg6[%c0_34, %c160], %98 {strides = array<i32>} : memref<8x256xf32, #tpu.memory_space<vmem>>, vector<8x32xf32>,
    %100 = vector.extract_strided_slice %3 {offsets = [0, 192], sizes = [8, 32], strides = [1, 1]} : vector<8x768xf32> to vector<8x32xf32>
    %101 = vector.extract_strided_slice %3 {offsets = [0, 448], sizes = [8, 32], strides = [1, 1]} : vector<8x768xf32> to vector<8x32xf32>
    %102 = vector.extract_strided_slice %3 {offsets = [0, 704], sizes = [8, 32], strides = [1, 1]} : vector<8x768xf32> to vector<8x32xf32>
    %cst_35 = arith.constant dense<0.000000e+00> : vector<8x8xf32>
    %103 = tpu.matmul %100, %101, %cst_35 {dimension_numbers = #tpu.dot_dimension_numbers<[1], [1], [0], [0], [0, 0, 1, 0], [], []>} : vector<8x32xf32>, vector<8x32xf32>, vector<8x8xf32> -> vector<8x8xf32>
    %cst_36 = arith.constant dense<0xFF800000> : vector<8xf32>
    %104 = vector.multi_reduction <maximumf>, %103, %cst_36 [1] : vector<8x8xf32> to vector<8xf32>
    %105 = vector.shape_cast %104 : vector<8xf32> to vector<8x1xf32>
    %106 = vector.broadcast %105 : vector<8x1xf32> to vector<8x8xf32>
    %107 = arith.subf %103, %106 : vector<8x8xf32>
    %108 = math.exp %107 : vector<8x8xf32>
    %cst_37 = arith.constant dense<0.000000e+00> : vector<8xf32>
    %109 = vector.multi_reduction <add>, %108, %cst_37 [1] : vector<8x8xf32> to vector<8xf32>
    %110 = vector.shape_cast %109 : vector<8xf32> to vector<8x1xf32>
    %111 = tpu.reciprocal %110 {approx = true} : vector<8x1xf32> -> vector<8x1xf32>
    %112 = vector.broadcast %111 : vector<8x1xf32> to vector<8x8xf32>
    %113 = arith.mulf %108, %112 : vector<8x8xf32>
    %cst_38 = arith.constant dense<0.000000e+00> : vector<8x32xf32>
    %114 = tpu.matmul %113, %102, %cst_38 {dimension_numbers = #tpu.dot_dimension_numbers<[1], [0], [0], [1], [0, 0, 1, 1], [], []>} : vector<8x8xf32>, vector<8x32xf32>, vector<8x32xf32> -> vector<8x32xf32>
    %c0_39 = arith.constant 0 : index
    %c192 = arith.constant 192 : index
    %115 = vector.load %arg6[%c0_39, %c192] : memref<8x256xf32, #tpu.memory_space<vmem>>, vector<8x32xf32>
    tpu.vector_store %arg6[%c0_39, %c192], %114 {strides = array<i32>} : memref<8x256xf32, #tpu.memory_space<vmem>>, vector<8x32xf32>,
    %116 = vector.extract_strided_slice %3 {offsets = [0, 224], sizes = [8, 32], strides = [1, 1]} : vector<8x768xf32> to vector<8x32xf32>
    %117 = vector.extract_strided_slice %3 {offsets = [0, 480], sizes = [8, 32], strides = [1, 1]} : vector<8x768xf32> to vector<8x32xf32>
    %118 = vector.extract_strided_slice %3 {offsets = [0, 736], sizes = [8, 32], strides = [1, 1]} : vector<8x768xf32> to vector<8x32xf32>
    %cst_40 = arith.constant dense<0.000000e+00> : vector<8x8xf32>
    %119 = tpu.matmul %116, %117, %cst_40 {dimension_numbers = #tpu.dot_dimension_numbers<[1], [1], [0], [0], [0, 0, 1, 0], [], []>} : vector<8x32xf32>, vector<8x32xf32>, vector<8x8xf32> -> vector<8x8xf32>
    %cst_41 = arith.constant dense<0xFF800000> : vector<8xf32>
    %120 = vector.multi_reduction <maximumf>, %119, %cst_41 [1] : vector<8x8xf32> to vector<8xf32>
    %121 = vector.shape_cast %120 : vector<8xf32> to vector<8x1xf32>
    %122 = vector.broadcast %121 : vector<8x1xf32> to vector<8x8xf32>
    %123 = arith.subf %119, %122 : vector<8x8xf32>
    %124 = math.exp %123 : vector<8x8xf32>
    %cst_42 = arith.constant dense<0.000000e+00> : vector<8xf32>
    %125 = vector.multi_reduction <add>, %124, %cst_42 [1] : vector<8x8xf32> to vector<8xf32>
    %126 = vector.shape_cast %125 : vector<8xf32> to vector<8x1xf32>
    %127 = tpu.reciprocal %126 {approx = true} : vector<8x1xf32> -> vector<8x1xf32>
    %128 = vector.broadcast %127 : vector<8x1xf32> to vector<8x8xf32>
    %129 = arith.mulf %124, %128 : vector<8x8xf32>
    %cst_43 = arith.constant dense<0.000000e+00> : vector<8x32xf32>
    %130 = tpu.matmul %129, %118, %cst_43 {dimension_numbers = #tpu.dot_dimension_numbers<[1], [0], [0], [1], [0, 0, 1, 1], [], []>} : vector<8x8xf32>, vector<8x32xf32>, vector<8x32xf32> -> vector<8x32xf32>
    %c0_44 = arith.constant 0 : index
    %c224 = arith.constant 224 : index
    %131 = vector.load %arg6[%c0_44, %c224] : memref<8x256xf32, #tpu.memory_space<vmem>>, vector<8x32xf32>
    tpu.vector_store %arg6[%c0_44, %c224], %130 {strides = array<i32>} : memref<8x256xf32, #tpu.memory_space<vmem>>, vector<8x32xf32>,
    %c0_45 = arith.constant 0 : index
    %c0_46 = arith.constant 0 : index
    %132 = vector.load %arg6[%c0_45, %c0_46] : memref<8x256xf32, #tpu.memory_space<vmem>>, vector<8x256xf32>
    %c0_47 = arith.constant 0 : index
    %c0_48 = arith.constant 0 : index
    %133 = vector.load %arg3[%c0_47, %c0_48] : memref<256x32xf32, #tpu.memory_space<vmem>>, vector<256x32xf32>
    %cst_49 = arith.constant dense<0.000000e+00> : vector<8x32xf32>
    %134 = tpu.matmul %132, %133, %cst_49 {dimension_numbers = #tpu.dot_dimension_numbers<[1], [0], [0], [1], [0, 0, 1, 1], [], []>} : vector<8x256xf32>, vector<256x32xf32>, vector<8x32xf32> -> vector<8x32xf32>
    %c0_50 = arith.constant 0 : index
    %c0_51 = arith.constant 0 : index
    %135 = vector.load %arg4[%c0_50, %c0_51] : memref<1x32xf32, #tpu.memory_space<vmem>>, vector<1x32xf32>
    %136 = vector.broadcast %135 : vector<1x32xf32> to vector<8x32xf32>
    %137 = arith.addf %134, %136 : vector<8x32xf32>
    %c0_52 = arith.constant 0 : index
    %c0_53 = arith.constant 0 : index
    %c0_54 = arith.constant 0 : index
    %138 = vector.load %arg5[%c0_52, %c0_53, %c0_54] : memref<1x8x32xf32, #tpu.memory_space<vmem>>, vector<1x8x32xf32>
    %139 = vector.shape_cast %138 : vector<1x8x32xf32> to vector<8x32xf32>
    %140 = vector.shape_cast %137 : vector<8x32xf32> to vector<1x8x32xf32>
    tpu.vector_store %arg5[%c0_52, %c0_53, %c0_54], %140 {strides = array<i32>} : memref<1x8x32xf32, #tpu.memory_space<vmem>>, vector<1x8x32xf32>,
    return
  }
  func.func @transform_0(%arg0: i32) -> (i32, i32, i32) {
    %c0_i32 = arith.constant 0 : i32
    %c0_i32_0 = arith.constant 0 : i32
    %c0_i32_1 = arith.constant 0 : i32
    return %arg0, %c0_i32, %c0_i32_0 : i32, i32, i32
  }
  func.func @transform_1(%arg0: i32) -> (i32, i32) {
    %c0_i32 = arith.constant 0 : i32
    %c0_i32_0 = arith.constant 0 : i32
    %c0_i32_1 = arith.constant 0 : i32
    return %c0_i32, %c0_i32_0 : i32, i32
  }
  func.func @transform_2(%arg0: i32) -> (i32, i32) {
    %c0_i32 = arith.constant 0 : i32
    %c0_i32_0 = arith.constant 0 : i32
    %c0_i32_1 = arith.constant 0 : i32
    return %c0_i32, %c0_i32_0 : i32, i32
  }
  func.func @transform_3(%arg0: i32) -> (i32, i32) {
    %c0_i32 = arith.constant 0 : i32
    %c0_i32_0 = arith.constant 0 : i32
    %c0_i32_1 = arith.constant 0 : i32
    return %c0_i32, %c0_i32_0 : i32, i32
  }
  func.func @transform_4(%arg0: i32) -> (i32, i32, i32) {
    %c0_i32 = arith.constant 0 : i32
    %c0_i32_0 = arith.constant 0 : i32
    %c0_i32_1 = arith.constant 0 : i32
    return %arg0, %c0_i32, %c0_i32_0 : i32, i32, i32
  }
}

</mosaic_0001>

<bundles_post_ra>
// kernel: tpu_custom_call.1
= control target key start
LH: loop header
LB: loop body
LE: loop exit
PB: predicated region body
PF: predicated region fallthrough
CT: control target
= control target key end

     0   :  { %9 = vsyncpa [#allocation4], 0  ;;  %s1608_s0 = inlined_call_operand.vmem [shape: f32[2,8,32], index: 0, kind: input, shape index: {}]   ;;  %s1609_s1 = inlined_call_operand.vmem [shape: f32[32,768], index: 1, kind: input, shape index: {}]   ;;  %s1610_s2 = inlined_call_operand.vmem [shape: f32[256,32], index: 2, kind: input, shape index: {}]   ;;  %s1611_s3 = inlined_call_operand.vmem [shape: f32[1,32], index: 3, kind: input, shape index: {}]   ;;  %s1612_s4 = inlined_call_operand.hbm [shape: f32[2,8,32], index: 4, kind: output, shape index: {}]  }
   0x1   :  { %11 = vsyncpa [#allocation4 + $0x1], 0  ;;  %s1251_s15 = smov 0   ;;  %s1253_s16 = smov 0  }
   0x2   :  { %s1255_s17 = smov 0   ;;  %s1257_s18 = smov 0  }
   0x3 LB: > { %s1272_s19 = sadd.s32 4294967295, %s1221_s18   ;;  %s1044_s20 = sadd.s32 4294967294, %s1221_s18   ;;  %s1221_s18 = sphi %s1257_s18, %s1618_s18   ;;  %s1217_s17 = sphi %s1255_s17, %s1617_s17   ;;  %s1213_s16 = sphi %s1253_s16, %s1616_s16   ;;  %s1209_s15 = sphi %s1251_s15, %s1615_s15  }
   0x4   : > { %s1276_s21 = sadd.s32 1, %s1221_s18   ;;  %s113_s22 = sadd.s32 1, %s1217_s17 }
   0x5   : > { %s110_s23 = ssub.s32 %s1221_s18, %s1276_s21  ;;  %p123_p0 = scmp.ne.s32.totalorder %s1217_s17, %s1213_s16 }
   0x6   : > { %p111_p1 = scmp.eq.s32.totalorder %s110_s23, 0  ;;  %p124_p2 = scmp.eq.s32.totalorder %s1272_s19, 1 }
   0x7   : > { %p129_p3 = scmp.ne.s32.totalorder %s1213_s16, %s1209_s15  ;;  %p130_p4 = scmp.eq.s32.totalorder %s1044_s20, 1 }
   0x8   : > { %s1287_s24 = scalar_select %p111_p1, %s1217_s17, %s113_s22  }
   0x9   : > { %p1289_p5 = por %p124_p2, %p123_p0  ;;  %p1293_p6 = por %p130_p4, %p129_p3 }
   0xa   : > { %p1047_p7 = scmp.ge.s32.totalorder %s1221_s18, 1  ;;  %p164_p8 = scmp.lt.s32.totalorder %s1221_s18, 3 }
   0xc   : > { %p165_p9 = pnand %p1047_p7, %p164_p8 }
   0xd   : > { %p189_p10 = scmp.lt.s32.totalorder (!%p165_p9), %s1272_s19, 1  ;;  %s1223_s30 = smov (!%p165_p9), 32  }
   0xe   : > { %168 = sbr.rel (%p165_p9) target bundleno = 1160 (0x488), region = 36  ;;  %s1224_s5 = smov (!%p165_p9), 96  }
   0xf   : > { %s1225_s6 = smov (!%p165_p9), 64   ;;  %s186_s10 = sand.u32 (!%p165_p9), 1, %s1213_s16  }
  0x10   : > { %s1048_s11 = sshll.u32 (!%p165_p9), %s186_s10, 3  ;;  %s1179_s8 = scalar_lea.hbm (!%p165_p9), %s1612_s4, 16 }
  0x11   : > { %s188_s22 = scalar_lea.vmem (!%p165_p9), [#allocation3], %s1048_s11 }
  0x13   : > { %v212_v0 = vld [vmem:[%s1609_s1 + $0x90] sm:$0xff]  ;;  %v206_v1 = vld [vmem:[%s1609_s1 + $0x60] sm:$0xff]  ;;  %s190_s7 = scalar_select %p189_p10, %s1272_s19, 1  ;;  %v213_v3 = vld [vmem:[%s1609_s1 + $0x98] sm:$0xff]  ;;  %vm218_vm0 = vcmask 261120   ;;  %vm368_vm1 = vcmask 64512  }
  0x14   : > { %234 = vmatpush.msra.mxu0 %v212_v0  ;;  %v200_v2 = vld [vmem:[%s1609_s1 + $0x30] sm:$0xff]  ;;  %254 = vmatpush.msra.mxu1 %v213_v3  ;;  %v207_v4 = vld [vmem:[%s1609_s1 + $0x68] sm:$0xff]  ;;  %v194_v5 = vld [vmem:[%s1609_s1] sm:$0xff]  ;;  %vm474_vm2 = vcmask 523520   ;;  %vm545_vm3 = vcmask 785920   ;;  %vm616_vm4 = vcmask 1048320  }
  0x15   : > { %s1049_s14 = sshll.u32 %s190_s7, 3  ;;  %v201_v6 = vld [vmem:[%s1609_s1 + $0x38] sm:$0xff]  ;;  %v214_v8 = vld [vmem:[%s1609_s1 + $0xa0] sm:$0xff]  ;;  %v195_v9 = vld [vmem:[%s1609_s1 + $0x8] sm:$0xff] }
  0x16   : > { %235 = vmatpush.msra.mxu0 %v206_v1  ;;  %s192_s28 = scalar_lea.vmem %s1608_s0, %s1049_s14  ;;  %255 = vmatpush.msra.mxu1 %v207_v4  ;;  %v208_v10 = vld [vmem:[%s1609_s1 + $0x70] sm:$0xff]  ;;  %v215_v11 = vld [vmem:[%s1609_s1 + $0xa8] sm:$0xff]  ;;  %v202_v12 = vld [vmem:[%s1609_s1 + $0x40] sm:$0xff] }
  0x17   : > { %v1325_v7 = vld [vmem:[%s192_s28] sm:$0xff]  ;;  %v209_v13 = vld [vmem:[%s1609_s1 + $0x78] sm:$0xff]  ;;  %v196_v14 = vld [vmem:[%s1609_s1 + $0x10] sm:$0xff] }
  0x18   : > { %236 = vmatpush.msra.mxu0 %v200_v2  ;;  %256 = vmatpush.msra.mxu1 %v201_v6  ;;  %v203_v15 = vld [vmem:[%s1609_s1 + $0x48] sm:$0xff]  ;;  %v197_v16 = vld [vmem:[%s1609_s1 + $0x18] sm:$0xff]  ;;  %v216_v21 = vld [vmem:[%s1609_s1 + $0xb0] sm:$0xff] }
  0x19   : > { %v210_v22 = vld [vmem:[%s1609_s1 + $0x80] sm:$0xff]  ;;  %v204_v23 = vld [vmem:[%s1609_s1 + $0x50] sm:$0xff]  ;;  %v217_v40 = vld [vmem:[%s1609_s1 + $0xb8] sm:$0xff] }
  0x1a   : > { %237 = vmatpush.msra.mxu0 %v194_v5  ;;  %257 = vmatpush.msra.mxu1 %v195_v9  ;;  %v198_v24 = vld [vmem:[%s1609_s1 + $0x20] sm:$0xff]  ;;  %v211_v41 = vld [vmem:[%s1609_s1 + $0x88] sm:$0xff]  ;;  %v205_v42 = vld [vmem:[%s1609_s1 + $0x58] sm:$0xff] }
  0x1b   : > { %1050 = vmatmul.msk.f32.vlgmr.msra.gmra.mxu0 %vm218_vm0, %v1325_v7  ;;  %1051 = vmatmul.msk.f32.vlgmr.msra.gmra.mxu1 %vm218_vm0, %v1325_v7  ;;  %v199_v43 = vld [vmem:[%s1609_s1 + $0x28] sm:$0xff] }
  0x1c   : > { %274 = vmatpush.msrb.mxu0 %v214_v8  ;;  %294 = vmatpush.msrb.mxu1 %v215_v11 }
  0x1e   : > { %275 = vmatpush.msrb.mxu0 %v208_v10  ;;  %295 = vmatpush.msrb.mxu1 %v209_v13 }
  0x20   : > { %276 = vmatpush.msrb.mxu0 %v202_v12  ;;  %296 = vmatpush.msrb.mxu1 %v203_v15 }
  0x22   : > { %277 = vmatpush.msrb.mxu0 %v196_v14  ;;  %297 = vmatpush.msrb.mxu1 %v197_v16 }
  0x23   : > { %1052 = vmatmul.msk.f32.vlgmr.msrb.gmra.mxu0 %vm218_vm0, %v1325_v7  ;;  %1053 = vmatmul.msk.f32.vlgmr.msrb.gmra.mxu1 %vm218_vm0, %v1325_v7 }
  0x24   : > { %314 = vmatpush.msra.mxu0 %v216_v21  ;;  %334 = vmatpush.msra.mxu1 %v217_v40 }
  0x26   : > { %315 = vmatpush.msra.mxu0 %v210_v22  ;;  %335 = vmatpush.msra.mxu1 %v211_v41 }
  0x28   : > { %316 = vmatpush.msra.mxu0 %v204_v23  ;;  %336 = vmatpush.msra.mxu1 %v205_v42 }
  0x2a   : > { %317 = vmatpush.msra.mxu0 %v198_v24  ;;  %337 = vmatpush.msra.mxu1 %v199_v43 }
  0x2b   : > { %1054 = vmatmul.msk.f32.vlgmr.msra.gmra.mxu0 %vm218_vm0, %v1325_v7  ;;  %1055 = vmatmul.msk.f32.vlgmr.msra.gmra.mxu1 %vm218_vm0, %v1325_v7 }
  0x98   : > { %v239_v17 = vpop.f32.mrf.mxu0  ;;  %v259_v18 = vpop.f32.mrf.mxu1 }
  0x99   : > { %547 = vrot.lane.b32.xlu2 %v239_v17, %s1223_s30 }
  0xa0   : > { %v279_v19 = vpop.f32.mrf.mxu0  ;;  %v299_v20 = vpop.f32.mrf.mxu1 }
  0xa1   : > { %549 = vrot.lane.b32.xlu2 %v279_v19, %s1223_s30  ;;  %406 = vrot.lane.b32.xlu1 %v279_v19, %s1224_s5 }
  0xa2   : > { %478 = vrot.lane.b32.xlu0 %v279_v19, %s1225_s6  ;;  %1056 = vmatpush.xpose.msk.msra.mxu2 %vm218_vm0, %v279_v19 }
  0xa5   : > { %1057 = vmatmul.msk.f32.vlgmr.msra.gmra.mxu2 %vm218_vm0, %v239_v17 }
  0xa8   : > { %v1405_v39 = vpop.f32.mrf.mxu0 }
  0xa9   : > { %404 = vrot.lane.b32.xlu1 %v239_v17, %s1224_s5  ;;  %681 = vrot.lane.b32.xlu2 %v299_v20, %s1224_s5 }
  0xaa   : > { %476 = vrot.lane.b32.xlu0 %v239_v17, %s1225_s6  ;;  %398 = vmatpush.msra.mxu3 %v1405_v39 }
  0xb1   : > { %750 = vrot.lane.b32.xlu1 %v259_v18, %s1225_s6  ;;  %820 = vrot.lane.b32.xlu2 %v259_v18, %s1223_s30 }
  0xb2   : > { %752 = vrot.lane.b32.xlu0 %v299_v20, %s1225_s6 }
  0xb9   : > { %822 = vrot.lane.b32.xlu1 %v299_v20, %s1223_s30 }
  0xba   : > { %679 = vrot.lane.b32.xlu0 %v259_v18, %s1224_s5 }
  0xf3   : > { %v548_v25 = vpop.permute.xlu2 %547 }
  0xfb   : > { %v550_v26 = vpop.permute.xlu2 %549 }
 0x103   : > { %v682_v29 = vpop.permute.xlu2 %681 }
 0x10b   : > { %v821_v38 = vpop.permute.xlu2 %820 }
 0x113   : > { %v407_v27 = vpop.permute.xlu1 %406 }
 0x114   : > { %v479_v28 = vpop.permute.xlu0 %478  ;;  %1059 = vmatpush.xpose.msk.msrb.mxu0 %vm218_vm0, %v407_v27 }
 0x115   : > { %1062 = vmatpush.xpose.msk.msrb.mxu2 %vm218_vm0, %v479_v28 }
 0x118   : > { %1065 = vmatpush.xpose.msk.msra.mxu0 %vm218_vm0, %v550_v26 }
 0x119   : > { %1068 = vmatpush.xpose.msk.msra.mxu2 %vm218_vm0, %v299_v20 }
 0x11b   : > { %v405_v30 = vpop.permute.xlu1 %404 }
 0x11c   : > { %v477_v31 = vpop.permute.xlu0 %476  ;;  %1060 = vmatmul.msk.f32.vlgmr.msrb.gmra.mxu0 %vm218_vm0, %v405_v30 }
 0x11d   : > { %1063 = vmatmul.msk.f32.vlgmr.msrb.gmra.mxu2 %vm218_vm0, %v477_v31  ;;  %1071 = vmatpush.xpose.msk.msrb.mxu0 %vm218_vm0, %v682_v29 }
 0x123   : > { %v751_v32 = vpop.permute.xlu1 %750 }
 0x124   : > { %v753_v33 = vpop.permute.xlu0 %752  ;;  %1066 = vmatmul.msk.f32.vlgmr.msra.gmra.mxu0 %vm218_vm0, %v548_v25 }
 0x125   : > { %1069 = vmatmul.msk.f32.vlgmr.msra.gmra.mxu2 %vm218_vm0, %v259_v18 }
 0x126   : > { %1074 = vmatpush.xpose.msk.msrb.mxu2 %vm218_vm0, %v753_v33 }
 0x128   : > { %v365_v34 = vpop.f32.mrf.mxu2 }
 0x129   : > { %v369_v35 = vsel %vm368_vm1, %v365_v34, -inf }
 0x12a   : > { %370 = vmax.xlane.f32.xlu0 %v369_v35 }
 0x12b   : > { %v823_v36 = vpop.permute.xlu1 %822 }
 0x12c   : > { %v680_v37 = vpop.permute.xlu0 %679  ;;  %1077 = vmatpush.xpose.msk.msra.mxu0 %vm218_vm0, %v823_v36 }
 0x12d   : > { %1072 = vmatmul.msk.f32.vlgmr.msrb.gmra.mxu0 %vm218_vm0, %v680_v37  ;;  %1075 = vmatmul.msk.f32.vlgmr.msrb.gmra.mxu2 %vm218_vm0, %v751_v32  ;;  %v339_v37 = vpop.f32.mrf.mxu1 }
 0x135   : > { %1078 = vmatmul.msk.f32.vlgmr.msra.gmra.mxu0 %vm218_vm0, %v821_v38 }
 0x199   : > { %v429_v44 = vpop.f32.mrf.mxu0 }
 0x19a   : > { %v432_v45 = vsel %vm368_vm1, %v429_v44, -inf }
 0x19b   : > { %433 = vmax.xlane.f32.xlu1 %v432_v45 }
 0x19d   : > { %v371_v46 = vpop.xlane.xlu0 %370 }
 0x19e   : > { %v372_v50 = vsub.f32 %v365_v34, %v371_v46 }
 0x1a0   : > { %v501_v47 = vpop.f32.mrf.mxu2  ;;  %v373_v51 = vmul.f32 1.442695, %v372_v50 }
 0x1a1   : > { %v504_v48 = vsel %vm368_vm1, %v501_v47, -inf  ;;  %v572_v49 = vpop.f32.mrf.mxu0 }
 0x1a2   : > { %505 = vmax.xlane.f32.xlu2 %v504_v48  ;;  %v575_v54 = vsel %vm368_vm1, %v572_v49, -inf  ;;  %1127 = vpow2.f32 %v373_v51 }
 0x1a8   : > { %v641_v52 = vpop.f32.mrf.mxu2  ;;  %v1128_v57 = vpop.eup %1127 }
 0x1a9   : > { %v644_v53 = vsel %vm368_vm1, %v641_v52, -inf  ;;  %v375_v62 = vsel %vm368_vm1, %v1128_v57, 0.0 }
 0x1aa   : > { %645 = vmax.xlane.f32.xlu0 %v644_v53  ;;  %v704_v55 = vpop.f32.mrf.mxu0  ;;  %576 = vmax.xlane.f32.xlu2 %v575_v54 }
 0x1ab   : > { %v707_v56 = vsel %vm368_vm1, %v704_v55, -inf }
 0x1ac   : > { %708 = vmax.xlane.f32.xlu1 %v707_v56 }
 0x1b0   : > { %v775_v58 = vpop.f32.mrf.mxu2 }
 0x1b1   : > { %v778_v59 = vsel %vm368_vm1, %v775_v58, -inf }
 0x1b2   : > { %v845_v60 = vpop.f32.mrf.mxu0  ;;  %779 = vmax.xlane.f32.xlu2 %v778_v59 }
 0x1b3   : > { %v848_v61 = vsel %vm368_vm1, %v845_v60, -inf }
 0x1b4   : > { %849 = vmax.xlane.f32.xlu0 %v848_v61  ;;  %376 = vadd.xlane.f32.xlu1 %v375_v62 }
 0x20e   : > { %v434_v63 = vpop.xlane.xlu1 %433 }
 0x20f   : > { %v435_v0 = vsub.f32 %v429_v44, %v434_v63 }
 0x211   : > { %v436_v1 = vmul.f32 1.442695, %v435_v0 }
 0x213   : > { %1129 = vpow2.f32 %v436_v1 }
 0x215   : > { %v506_v2 = vpop.xlane.xlu2 %505 }
 0x216   : > { %v507_v3 = vsub.f32 %v501_v47, %v506_v2 }
 0x218   : > { %v508_v4 = vmul.f32 1.442695, %v507_v3 }
 0x219   : > { %v1130_v5 = vpop.eup %1129 }
 0x21a   : > { %1131 = vpow2.f32 %v508_v4  ;;  %v438_v6 = vsel %vm368_vm1, %v1130_v5, 0.0 }
 0x21b   : > { %439 = vadd.xlane.f32.xlu2 %v438_v6 }
 0x21d   : > { %v577_v7 = vpop.xlane.xlu2 %576  ;;  %v646_v20 = vpop.xlane.xlu0 %645 }
 0x21e   : > { %v578_v8 = vsub.f32 %v572_v49, %v577_v7  ;;  %v647_v21 = vsub.f32 %v641_v52, %v646_v20  ;;  %v906_v7 = vld [vmem:[%s1610_s2 + $0x70] sm:$0xff]  ;;  %v895_v20 = vld [vmem:[%s1610_s2 + $0x18] sm:$0xff] }
 0x21f   : > { %v709_v9 = vpop.xlane.xlu1 %708 }
 0x220   : > { %v1431_v10 = vpop.eup %1131  ;;  %v579_v11 = vmul.f32 1.442695, %v578_v8  ;;  %v648_v23 = vmul.f32 1.442695, %v647_v21  ;;  %v710_v24 = vsub.f32 %v704_v55, %v709_v9  ;;  %v905_v8 = vld [vmem:[%s1610_s2 + $0x68] sm:$0xff]  ;;  %v904_v9 = vld [vmem:[%s1610_s2 + $0x60] sm:$0xff] }
 0x221   : > { %v510_v12 = vsel %vm368_vm1, %v1431_v10, 0.0  ;;  %v894_v21 = vld [vmem:[%s1610_s2 + $0x10] sm:$0xff] }
 0x222   : > { %511 = vadd.xlane.f32.xlu0 %v510_v12  ;;  %1133 = vpow2.f32 %v579_v11  ;;  %v711_v27 = vmul.f32 1.442695, %v710_v24  ;;  %v902_v11 = vld [vmem:[%s1610_s2 + $0x50] sm:$0xff] }
 0x225   : > { %v780_v18 = vpop.xlane.xlu2 %779 }
 0x226   : > { %v781_v19 = vsub.f32 %v775_v58, %v780_v18  ;;  %v896_v18 = vld [vmem:[%s1610_s2 + $0x20] sm:$0xff] }
 0x227   : > { %v377_v13 = vpop.xlane.xlu1 %376  ;;  %v850_v26 = vpop.xlane.xlu0 %849 }
 0x228   : > { %1135 = vrcp.f32 %v377_v13  ;;  %v1134_v14 = vpop.eup %1133  ;;  %v782_v22 = vmul.f32 1.442695, %v781_v19  ;;  %v851_v30 = vsub.f32 %v845_v60, %v850_v26  ;;  %v901_v13 = vld [vmem:[%s1610_s2 + $0x48] sm:$0xff] }
 0x229   : > { %v581_v15 = vsel %vm368_vm1, %v1134_v14, 0.0 }
 0x22a   : > { %582 = vadd.xlane.f32.xlu1 %v581_v15  ;;  %1137 = vpow2.f32 %v782_v22  ;;  %v852_v32 = vmul.f32 1.442695, %v851_v30  ;;  %v899_v15 = vld [vmem:[%s1610_s2 + $0x38] sm:$0xff]  ;;  %v893_v22 = vld [vmem:[%s1610_s2 + $0x8] sm:$0xff]  ;;  %v922_v30 = vld [vmem:[%s1610_s2 + $0xf0] sm:$0xff] }
 0x22b   : > { %1139 = vpow2.f32 %v648_v23  ;;  %v892_v23 = vld [vmem:[%s1610_s2] sm:$0xff] }
 0x22c   : > { %1141 = vpow2.f32 %v711_v27 }
 0x22d   : > { %1143 = vpow2.f32 %v852_v32  ;;  %v920_v32 = vld [vmem:[%s1610_s2 + $0xe0] sm:$0xff] }
 0x22e   : > { %v1136_v16 = vpop.eup %1135 }
 0x22f   : > { %v379_v17 = vmul.f32 %v1136_v16, %v1128_v57  ;;  %v898_v16 = vld [vmem:[%s1610_s2 + $0x30] sm:$0xff] }
 0x230   : > { %v1443_v25 = vpop.eup %1137 }
 0x231   : > { %1058 = vmatmul.msk.f32.vlgmr.msra.gmra.mxu3 %vm368_vm1, %v379_v17  ;;  %v784_v28 = vsel %vm368_vm1, %v1443_v25, 0.0  ;;  %v1140_v29 = vpop.eup %1139  ;;  %v897_v17 = vld [vmem:[%s1610_s2 + $0x28] sm:$0xff] }
 0x232   : > { %v650_v31 = vsel %vm368_vm1, %v1140_v29, 0.0  ;;  %v1142_v33 = vpop.eup %1141 }
 0x233   : > { %444 = vrot.lane.b32.xlu2 %v1405_v39, %s1224_s5  ;;  %v713_v34 = vsel %vm368_vm1, %v1142_v33, 0.0  ;;  %v1144_v35 = vpop.eup %1143 }
 0x234   : > { %v854_v36 = vsel %vm368_vm1, %v1144_v35, 0.0 }
 0x236   : > { %586 = vrot.lane.b32.xlu0 %v1405_v39, %s1223_s30 }
 0x243   : > { %515 = vrot.lane.b32.xlu1 %v1405_v39, %s1225_s6 }
 0x25c   : > { %785 = vadd.xlane.f32.xlu2 %v784_v28 }
 0x260   : > { %651 = vadd.xlane.f32.xlu0 %v650_v31  ;;  %v921_v31 = vld [vmem:[%s1610_s2 + $0xe8] sm:$0xff] }
 0x268   : > { %714 = vadd.xlane.f32.xlu0 %v713_v34  ;;  %v918_v34 = vld [vmem:[%s1610_s2 + $0xd0] sm:$0xff] }
 0x26d   : > { %855 = vadd.xlane.f32.xlu1 %v854_v36  ;;  %v916_v36 = vld [vmem:[%s1610_s2 + $0xc0] sm:$0xff] }
 0x27c   : > { %719 = vrot.lane.b32.xlu0 %v339_v37, %s1224_s5 }
 0x284   : > { %789 = vrot.lane.b32.xlu0 %v339_v37, %s1225_s6 }
 0x28c   : > { %859 = vrot.lane.b32.xlu0 %v339_v37, %s1223_s30 }
 0x28e   : > { %v440_v38 = vpop.xlane.xlu2 %439 }
 0x28f   : > { %1145 = vrcp.f32 %v440_v38  ;;  %v914_v38 = vld [vmem:[%s1610_s2 + $0xb0] sm:$0xff] }
 0x295   : > { %v1146_v39 = vpop.eup %1145  ;;  %v512_v43 = vpop.xlane.xlu0 %511 }
 0x296   : > { %v442_v40 = vmul.f32 %v1146_v39, %v1130_v5  ;;  %v445_v41 = vpop.permute.xlu2 %444  ;;  %v907_v5 = vld [vmem:[%s1610_s2 + $0x78] sm:$0xff]  ;;  %v913_v39 = vld [vmem:[%s1610_s2 + $0xa8] sm:$0xff] }
 0x297   : > { %465 = vmatpush.msrb.mxu1 %v445_v41  ;;  %928 = vmatpush.msra.mxu2 %v907_v5  ;;  %v911_v41 = vld [vmem:[%s1610_s2 + $0x98] sm:$0xff] }
 0x298   : > { %1061 = vmatmul.msk.f32.vlgmr.msrb.gmra.mxu1 %vm368_vm1, %v442_v40  ;;  %v912_v40 = vld [vmem:[%s1610_s2 + $0xa0] sm:$0xff] }
 0x299   : > { %929 = vmatpush.msra.mxu2 %v906_v7 }
 0x29b   : > { %930 = vmatpush.msra.mxu2 %v905_v8 }
 0x29d   : > { %v583_v42 = vpop.xlane.xlu1 %582  ;;  %931 = vmatpush.msra.mxu2 %v904_v9 }
 0x29e   : > { %1147 = vrcp.f32 %v583_v42  ;;  %v910_v42 = vld [vmem:[%s1610_s2 + $0x90] sm:$0xff] }
 0x29f   : > { %1149 = vrcp.f32 %v512_v43  ;;  %v909_v43 = vld [vmem:[%s1610_s2 + $0x88] sm:$0xff] }
 0x2a4   : > { %v1148_v44 = vpop.eup %1147 }
 0x2a5   : > { %v585_v45 = vmul.f32 %v1148_v44, %v1134_v14  ;;  %v1150_v47 = vpop.eup %1149  ;;  %v900_v14 = vld [vmem:[%s1610_s2 + $0x40] sm:$0xff] }
 0x2a6   : > { %v514_v50 = vmul.f32 %v1150_v47, %v1431_v10  ;;  %v903_v10 = vld [vmem:[%s1610_s2 + $0x58] sm:$0xff]  ;;  %v908_v44 = vld [vmem:[%s1610_s2 + $0x80] sm:$0xff] }
 0x2a7   : > { %932 = vmatpush.msra.mxu2 %v903_v10 }
 0x2a8   : > { %v587_v46 = vpop.permute.xlu0 %586 }
 0x2a9   : > { %607 = vmatpush.msra.mxu1 %v587_v46  ;;  %933 = vmatpush.msra.mxu2 %v902_v11 }
 0x2aa   : > { %1067 = vmatmul.msk.f32.vlgmr.msra.gmra.mxu1 %vm368_vm1, %v585_v45 }
 0x2ab   : > { %934 = vmatpush.msra.mxu2 %v901_v13 }
 0x2ad   : > { %935 = vmatpush.msra.mxu2 %v900_v14 }
 0x2af   : > { %936 = vmatpush.msra.mxu2 %v899_v15 }
 0x2b1   : > { %937 = vmatpush.msra.mxu2 %v898_v16 }
 0x2b3   : > { %938 = vmatpush.msra.mxu2 %v897_v17 }
 0x2b4   : > { %v400_v48 = vpop.f32.mrf.mxu3 }
 0x2b5   : > { %403 = vst.msk [vmem:[#allocation2] sm:$0xff] %vm218_vm0, %v400_v48  ;;  %v516_v49 = vpop.permute.xlu1 %515  ;;  %939 = vmatpush.msra.mxu2 %v896_v18 }
 0x2b6   : > { %536 = vmatpush.msrb.mxu3 %v516_v49  ;;  %v1126_v49 = vld [vmem:[%s1611_s3] ss:$0 sm:$0xff] }
 0x2b7   : > { %1064 = vmatmul.msk.f32.vlgmr.msrb.gmra.mxu3 %vm368_vm1, %v514_v50  ;;  %940 = vmatpush.msra.mxu2 %v895_v20 }
 0x2b8   : > { %673 = vmatpush.msra.mxu3 %v339_v37  ;;  %v915_v37 = vld [vmem:[%s1610_s2 + $0xb8] sm:$0xff] }
 0x2b9   : > { %941 = vmatpush.msra.mxu2 %v894_v21 }
 0x2bb   : > { %942 = vmatpush.msra.mxu2 %v893_v22 }
 0x2bd   : > { %943 = vmatpush.msra.mxu2 %v892_v23 }
 0x2cf   : > { %v786_v55 = vpop.xlane.xlu2 %785 }
 0x2d3   : > { %v652_v51 = vpop.xlane.xlu0 %651 }
 0x2d4   : > { %1151 = vrcp.f32 %v652_v51 }
 0x2da   : > { %v1152_v52 = vpop.eup %1151 }
 0x2db   : > { %v654_v53 = vmul.f32 %v1152_v52, %v1140_v29  ;;  %v715_v54 = vpop.xlane.xlu0 %714  ;;  %v923_v29 = vld [vmem:[%s1610_s2 + $0xf8] sm:$0xff] }
 0x2dc   : > { %1153 = vrcp.f32 %v715_v54 }
 0x2dd   : > { %1070 = vmatmul.msk.f32.vlgmr.msra.gmra.mxu3 %vm368_vm1, %v654_v53  ;;  %1155 = vrcp.f32 %v786_v55 }
 0x2e0   : > { %v856_v59 = vpop.xlane.xlu1 %855 }
 0x2e1   : > { %1157 = vrcp.f32 %v856_v59 }
 0x2e2   : > { %v1154_v56 = vpop.eup %1153 }
 0x2e3   : > { %v717_v57 = vmul.f32 %v1154_v56, %v1142_v33  ;;  %v1156_v60 = vpop.eup %1155  ;;  %v919_v33 = vld [vmem:[%s1610_s2 + $0xd8] sm:$0xff] }
 0x2e4   : > { %v788_v61 = vmul.f32 %v1156_v60, %v1443_v25 }
 0x2e7   : > { %v1158_v63 = vpop.eup %1157 }
 0x2e8   : > { %v858_v0 = vmul.f32 %v1158_v63, %v1144_v35  ;;  %v917_v35 = vld [vmem:[%s1610_s2 + $0xc8] sm:$0xff] }
 0x2ee   : > { %v720_v58 = vpop.permute.xlu0 %719 }
 0x2ef   : > { %740 = vmatpush.msrb.mxu1 %v720_v58 }
 0x2f0   : > { %1073 = vmatmul.msk.f32.vlgmr.msrb.gmra.mxu1 %vm368_vm1, %v717_v57 }
 0x2f6   : > { %v790_v62 = vpop.permute.xlu0 %789 }
 0x2f7   : > { %810 = vmatpush.msrb.mxu3 %v790_v62 }
 0x2f8   : > { %1076 = vmatmul.msk.f32.vlgmr.msrb.gmra.mxu3 %vm368_vm1, %v788_v61 }
 0x2f9   : > { %948 = vmatpush.msra.mxu3 %v923_v29 }
 0x2fb   : > { %949 = vmatpush.msra.mxu3 %v922_v30 }
 0x2fd   : > { %950 = vmatpush.msra.mxu3 %v921_v31 }
 0x2fe   : > { %v860_v1 = vpop.permute.xlu0 %859 }
 0x2ff   : > { %880 = vmatpush.msra.mxu1 %v860_v1  ;;  %951 = vmatpush.msra.mxu3 %v920_v32 }
 0x300   : > { %1079 = vmatmul.msk.f32.vlgmr.msra.gmra.mxu1 %vm368_vm1, %v858_v0 }
 0x301   : > { %952 = vmatpush.msra.mxu3 %v919_v33 }
 0x303   : > { %953 = vmatpush.msra.mxu3 %v918_v34 }
 0x305   : > { %954 = vmatpush.msra.mxu3 %v917_v35 }
 0x307   : > { %955 = vmatpush.msra.mxu3 %v916_v36 }
 0x309   : > { %956 = vmatpush.msra.mxu3 %v915_v37 }
 0x30b   : > { %957 = vmatpush.msra.mxu3 %v914_v38 }
 0x30d   : > { %958 = vmatpush.msra.mxu3 %v913_v39 }
 0x30f   : > { %959 = vmatpush.msra.mxu3 %v912_v40 }
 0x311   : > { %960 = vmatpush.msra.mxu3 %v911_v41 }
 0x313   : > { %961 = vmatpush.msra.mxu3 %v910_v42 }
 0x315   : > { %v467_v2 = vpop.f32.mrf.mxu1  ;;  %962 = vmatpush.msra.mxu3 %v909_v43 }
 0x316   : > { %471 = vrot.lane.b32.xlu0 %v467_v2, %s1223_s30 }
 0x317   : > { %963 = vmatpush.msra.mxu3 %v908_v44 }
 0x327   : > { %v609_v3 = vpop.f32.mrf.mxu1 }
 0x328   : > { %613 = vrot.lane.b32.xlu1 %v609_v3, %s1224_s5 }
 0x33a   : > { %v538_v4 = vpop.f32.mrf.mxu3 }
 0x33b   : > { %542 = vrot.lane.b32.xlu2 %v538_v4, %s1225_s6 }
 0x360   : > { %v675_v6 = vpop.f32.mrf.mxu3 }
 0x361   : > { %678 = vst.msk [vmem:[#allocation2 + $0x8] sm:$0xff] %vm218_vm0, %v675_v6 }
 0x36d   : > { %v742_v12 = vpop.f32.mrf.mxu1 }
 0x36e   : > { %746 = vrot.lane.b32.xlu0 %v742_v12, %s1223_s30  ;;  %s982_s30 = sshll.u32 %s188_s22, 4  ;;  %s983_s30 = int_to_ptr.vmem [resolvable:$true] %s982_s30 }
 0x37b   : > { %v812_v19 = vpop.f32.mrf.mxu3 }
 0x37c   : > { %816 = vrot.lane.b32.xlu0 %v812_v19, %s1225_s6  ;;  %s1081_s6 = sshll.u32 %s1272_s19, 3  ;;  %s970_s19 = scalar_lea.sflag [#allocation4], %s186_s10 }
 0x37d   : > { %v882_v24 = vpop.f32.mrf.mxu1  ;;  %s980_s20 = scalar_lea.hbm %s1612_s4, %s1081_s6 }
 0x37e   : > { %s984_s23 = sshll.u32 %s980_s20, 4  ;;  %s985_s23 = int_to_ptr.hbm [resolvable:$true] %s984_s23 }
 0x37f   : > { %s1173_s27 = sshra.s32 %s985_s23, 4  ;;  %s1174_s27 = int_to_ptr.hbm [resolvable:$true] %s1173_s27 }
 0x380   : > { %s1175_s28 = scalar_lea.hbm %s1174_s27, 8  ;;  %p1180_p0 = scmp.lt.s32.totalorder %s1174_s27, %s1612_s4 }
 0x381   : > { %p1176_p11 = scmp.ne.s32.totalorder %s1174_s27, %s1175_s28  ;;  %p1181_p1 = scmp.lt.s32.totalorder %s1179_s8, %s1175_s28 }
 0x383   : > { %p1177_p12 = pnand %p1176_p11, %p1289_p5  ;;  %p1182_p2 = por %p1181_p1, %p1180_p0 }
 0x384   : > { %886 = vrot.lane.b32.xlu0 %v882_v24, %s1224_s5 }
 0x385   : > { %p1178_p13 = pneg %p1177_p12 }
 0x387   : > { %p1183_p3 = pnand %p1182_p2, %p1178_p13 }
 0x388   : > { %v472_v25 = vpop.permute.xlu0 %471 }
 0x389   : > { %475 = vst.msk [vmem:[#allocation2] sm:$0xff] %vm474_vm2, %v472_v25 }
 0x395   : > { %v543_v26 = vpop.permute.xlu2 %542 }
 0x396   : > { %546 = vst.msk [vmem:[#allocation2] sm:$0xff] %vm545_vm3, %v543_v26 }
 0x39a   : > { %v614_v27 = vpop.permute.xlu1 %613 }
 0x39b   : > { %617 = vst.msk [vmem:[#allocation2] sm:$0xff] %vm616_vm4, %v614_v27 }
 0x3a2   : > { %v890_v28 = vld [vmem:[#allocation2] sm:$0xff] }
 0x3a3   : > { %944 = vmatmul.f32.vlgmr.msra.gmra.mxu2 %v890_v28 }
 0x3e0   : > { %v747_v45 = vpop.permute.xlu0 %746 }
 0x3e1   : > { %749 = vst.msk [vmem:[#allocation2 + $0x8] sm:$0xff] %vm474_vm2, %v747_v45 }
 0x3ee   : > { %v817_v46 = vpop.permute.xlu0 %816 }
 0x3ef   : > { %819 = vst.msk [vmem:[#allocation2 + $0x8] sm:$0xff] %vm545_vm3, %v817_v46 }
 0x3f6   : > { %v887_v47 = vpop.permute.xlu0 %886 }
 0x3f7   : > { %889 = vst.msk [vmem:[#allocation2 + $0x8] sm:$0xff] %vm616_vm4, %v887_v47 }
 0x3fe   : > { %v891_v48 = vld [vmem:[#allocation2 + $0x8] sm:$0xff] }
 0x3ff   : > { %964 = vmatmul.f32.vlgmr.msra.gmra.mxu3 %v891_v48 }
 0x426   : > { %v945_v50 = vpop.f32.mrf.mxu2 }
 0x427   : > { %v946_v51 = vadd.f32 %v1126_v49, %v945_v50 }
 0x482   : > { %v965_v52 = vpop.f32.mrf.mxu3 }
 0x483   : > { %v966_v53 = vadd.f32 %v965_v52, %v946_v51 }
 0x485   : > { %968 = vst.msk [vmem:[%s188_s22] sm:$0xff] %vm218_vm0, %v966_v53 }
 0x486   : > { %1186 = shalt.err (!%p1183_p3)
}
 0x487   : > { %1084 = dma.vmem_to_hbm [thread:$0]  (%p1289_p5), %s983_s30, 128, %s985_s23, %s970_s19  }
 0x488 PF: > { %p1090_p4 = scmp.ge.s32.totalorder %s1221_s18, 2  ;;  %s996_s10 = sand.u32 1, %s1209_s15  }
 0x489   : > { %s997_s6 = scalar_lea.sflag [#allocation4], %s996_s10 }
 0x48a   : > { %p1087_p7 = pnand %p1090_p4, %p1293_p6 }
 0x48c   : > { %p1088_p8 = pneg %p1087_p7 }
 0x48e   : > { %1204 = dma.done.wait (%p1088_p8), %s997_s6, 128  }
 0x48f   : > { %1206 = vsyncadd (%p1088_p8), %s997_s6, 4294967168  ;;  %p14_p9 = scmp.ge.s32.totalorder %s1276_s21, 4   ;;  %s1615_s15 = smov %s1213_s16 }
 0x490   : > { %s1616_s16 = smov %s1217_s17  ;;  %s1617_s17 = smov %s1287_s24 }
 0x491   : > { %s1618_s18 = smov %s1276_s21  ;;  %16 = sbr.rel (!%p14_p9) target bundleno = 3 (0x3), region = 71 }
 0x496   :  { %1003 = vsyncpa [#allocation4], 1 }
 0x497   :  { %1005 = vsyncpa [#allocation4 + $0x1], 1 }

</bundles_post_ra>
